<compile_context>
chip_gen: v6e
topology: v6e:2x2x1
jax: 0.10.0
libtpu: 0.0.40
codegen_flags: <defaults>
</compile_context>

<pallas_src>
import functools

import jax
import jax.numpy as jnp
from jax.experimental import pallas as pl
from jax.experimental.pallas import tpu as pltpu


def _mixed_loss_kernel(logits_ref, labels_ref, out_ref, acc_ref, *,
                       alpha, gamma, focal_weight, n_rows, block_rows,
                       steps_per_shard, mask_rows):
    shard = pl.program_id(0)
    step = pl.program_id(1)
    n_steps = pl.num_programs(1)

    @pl.when(step == 0)
    def _init():
        acc_ref[...] = jnp.zeros_like(acc_ref)

    logits = logits_ref[...].astype(jnp.float32)      # [TB, C] (upcast if bf16)
    labels = labels_ref[...]                          # [TB, 1] int32
    tb, c = logits.shape

    # --- stable softmax pieces (nothing but `exps` is full-tile & long-lived)
    m = jnp.max(logits, axis=-1, keepdims=True)       # [TB, 1]
    exps = jnp.exp(logits - m)                        # [TB, C]
    sumexp = jnp.sum(exps, axis=-1, keepdims=True)    # [TB, 1]

    # --- true-class logit via one-hot compare (single select + row reduce)
    col = jax.lax.broadcasted_iota(jnp.int32, (tb, c), 1)
    onehot = col == labels                            # [TB, C] bool
    logit_true = jnp.sum(jnp.where(onehot, logits, 0.0), axis=-1, keepdims=True)

    ce = (jnp.log(sumexp) + m) - logit_true           # per-row cross-entropy
    prob_true = jnp.exp(-ce)                          # softmax prob of true class
    focal = (alpha * (1.0 - prob_true) ** gamma) * ce
    mixed = ce + focal_weight * focal                 # [TB, 1]

    if mask_rows:
        # Mask rows past the real batch (partial last tile / replayed tiles).
        gtile = shard * steps_per_shard + step        # unclamped global tile id
        row = jax.lax.broadcasted_iota(jnp.int32, (tb, 1), 0) + gtile * block_rows
        mixed = jnp.where(row < n_rows, mixed, 0.0)

    acc_ref[...] = acc_ref[...] + mixed               # elementwise VPU add

    @pl.when(step == n_steps - 1)
    def _finalize():
        # Single cross-sublane reduce per shard; broadcast into the lane-dense
        # (1, 1, 128) output block.
        out_ref[...] = jnp.zeros_like(out_ref) + jnp.sum(acc_ref[...])


def _choose_block_rows(n_rows, n_cls, itemsize, sublane):
    """Batch tile sized for a ~20 MiB VMEM working set (inputs + temporaries)."""
    padded_c = ((n_cls + 127) // 128) * 128
    col_bytes = 512                              # one lane-padded (TB,1) f32 col
    per_row = (2 * padded_c * itemsize           # logits tile, double-buffered
               + 4 * padded_c * 4                # full-tile f32 temporaries
               + 2 * col_bytes                   # labels tile, double-buffered
               + 7 * col_bytes)                  # acc scratch + column temps
    budget = 20 * 1024 * 1024                    # headroom under 40 MiB limit
    cap = max(sublane, (budget // per_row) // sublane * sublane)
    cap = min(cap, 4096)                         # >=512 rows is already at the
                                                 # HBM-pipelining knee
    return n_rows if n_rows <= cap else cap


def _mixed_loss_single(y_pred, y_true, *, alpha, gamma, focal_weight,
                       block_rows=None, num_shards=2):
    n_rows, n_cls = y_pred.shape
    itemsize = jnp.dtype(y_pred.dtype).itemsize
    sublane = 16 if itemsize == 2 else (32 if itemsize == 1 else 8)
    labels2d = y_true.reshape(n_rows, 1).astype(jnp.int32)

    if block_rows is None:
        tb = _choose_block_rows(n_rows, n_cls, itemsize, sublane)
    else:
        tb = min(int(block_rows), n_rows)
        if tb < n_rows:                          # partial blocks must be
            tb = max(sublane, tb // sublane * sublane)  # sublane-aligned

    n_total = pl.cdiv(n_rows, tb)                # total batch tiles
    shards = max(1, min(int(num_shards), n_total))
    sps = pl.cdiv(n_total, shards)               # steps per shard
    mask_rows = (n_rows % tb != 0) or (shards * sps != n_total)

    def tile_idx(s, i):
        # Clamp replayed tiles (shards * sps may exceed n_total); their rows
        # are zeroed by the in-kernel row mask.
        return jnp.minimum(s * sps + i, n_total - 1)

    kernel = functools.partial(
        _mixed_loss_kernel,
        alpha=float(alpha), gamma=gamma, focal_weight=float(focal_weight),
        n_rows=n_rows, block_rows=tb, steps_per_shard=sps,
        mask_rows=mask_rows)

    partial = pl.pallas_call(
        kernel,
        out_shape=jax.ShapeDtypeStruct((shards, 1, 128), jnp.float32),
        grid_spec=pltpu.PrefetchScalarGridSpec(
            num_scalar_prefetch=0,
            grid=(shards, sps),
            in_specs=[
                pl.BlockSpec((tb, n_cls), lambda s, i: (tile_idx(s, i), 0)),
                pl.BlockSpec((tb, 1), lambda s, i: (tile_idx(s, i), 0)),
            ],
            out_specs=pl.BlockSpec((1, 1, 128), lambda s, i: (s, 0, 0)),
            scratch_shapes=[pltpu.VMEM((tb, 1), jnp.float32)],
        ),
        compiler_params=pltpu.CompilerParams(
            dimension_semantics=("parallel", "arbitrary"),
            vmem_limit_bytes=40 * 1024 * 1024,
        ),
    )(y_pred, labels2d)

    # Per-shard partial sums -> final mean in f32 (tiny XLA reduce).
    return jnp.sum(partial[:, 0, 0]) * (1.0 / n_rows)


def mixed_loss(y_pred, y_true, weight=None, *, alpha=0.25, gamma=2,
               focal_weight=1.0, block_rows=None, num_shards=2):
    """MixedLoss.forward: y_pred [B, C] logits (or list of them), y_true [B]."""
    if isinstance(y_pred, (list, tuple)):
        if weight is None:
            weight = [1.0] * len(y_pred)
        # TODO(synk): fuse equal-shape heads into one pallas_call (stack on a
        # leading grid axis) to avoid re-streaming labels once per head.
        total = 0.0
        for w, yp in zip(weight, y_pred):
            total = total + w * _mixed_loss_single(
                yp, y_true, alpha=alpha, gamma=gamma,
                focal_weight=focal_weight, block_rows=block_rows,
                num_shards=num_shards)
        return total / len(y_pred)
    return _mixed_loss_single(y_pred, y_true, alpha=alpha, gamma=gamma,
                              focal_weight=focal_weight,
                              block_rows=block_rows, num_shards=num_shards)


def _mixed_loss_ref(y_pred, y_true, *, alpha=0.25, gamma=2, focal_weight=1.0):
    """Pure-JAX reference mirroring the PyTorch forward (single-tensor path)."""
    log_probs = jax.nn.log_softmax(y_pred.astype(jnp.float32), axis=1)
    ce = -jnp.take_along_axis(log_probs, y_true[:, None], axis=1)[:, 0]
    prob_true = jnp.take_along_axis(
        jax.nn.softmax(y_pred.astype(jnp.float32), axis=1),
        y_true[:, None], axis=1)[:, 0]
    focal = alpha * (1.0 - prob_true) ** gamma * ce
    return jnp.mean(ce + focal_weight * focal)


if __name__ == "__main__":
    key = jax.random.PRNGKey(0)
    k1, k2, k3, k4, k5, k6, k7, k8 = jax.random.split(key, 8)

    # Case 1: tiny single-tile path (B fits one block, one shard).
    B, C = 8, 16
    y_pred = jax.random.normal(k1, (B, C), dtype=jnp.float32)
    y_true = jax.random.randint(k2, (B,), 0, C, dtype=jnp.int32)
    out = jax.block_until_ready(mixed_loss(y_pred, y_true))
    ref = _mixed_loss_ref(y_pred, y_true)
    assert jnp.allclose(out, ref, atol=2e-5, rtol=2e-5), (out, ref)

    # Case 2: multi-tile streaming with dual-shard grid, a clamped/replayed
    # tile and a partial (masked) last tile.
    B2, C2 = 20, 16
    y_pred2 = jax.random.normal(k3, (B2, C2), dtype=jnp.float32)
    y_true2 = jax.random.randint(k4, (B2,), 0, C2, dtype=jnp.int32)
    out2 = jax.block_until_ready(mixed_loss(y_pred2, y_true2, block_rows=8))
    ref2 = _mixed_loss_ref(y_pred2, y_true2)
    assert jnp.allclose(out2, ref2, atol=2e-5, rtol=2e-5), (out2, ref2)

    # Case 3: class count that is > 128 and not a multiple of 128 (lane-pad
    # masking of row-wise max / sum reductions).
    B3, C3 = 16, 200
    y_pred3 = jax.random.normal(k5, (B3, C3), dtype=jnp.float32)
    y_true3 = jax.random.randint(k6, (B3,), 0, C3, dtype=jnp.int32)
    out3 = jax.block_until_ready(mixed_loss(y_pred3, y_true3))
    ref3 = _mixed_loss_ref(y_pred3, y_true3)
    assert jnp.allclose(out3, ref3, atol=2e-5, rtol=2e-5), (out3, ref3)

    # Case 4: bf16 logits ingested unconverted (upcast inside the kernel),
    # multi-tile with bf16-native sublane rounding.
    B4, C4 = 24, 64
    y_pred4 = jax.random.normal(k7, (B4, C4), dtype=jnp.float32)
    y_true4 = jax.random.randint(k8, (B4,), 0, C4, dtype=jnp.int32)
    out4 = jax.block_until_ready(
        mixed_loss(y_pred4.astype(jnp.bfloat16), y_true4, block_rows=16))
    ref4 = _mixed_loss_ref(y_pred4.astype(jnp.bfloat16), y_true4)
    assert jnp.allclose(out4, ref4, atol=2e-5, rtol=2e-5), (out4, ref4)

    # Case 5: list-of-logits path (matches the PyTorch list branch).
    out5 = jax.block_until_ready(mixed_loss([y_pred, y_pred], y_true))
    assert jnp.allclose(out5, ref, atol=2e-5, rtol=2e-5), (out5, ref)

    print("KERNEL_OK")
</pallas_src>

<mosaic_0001>
module attributes {stable_mosaic.version = 11 : i64} {
  func.func @_mixed_loss_kernel(%arg0: i32, %arg1: i32, %arg2: memref<8x16xf32, #tpu.memory_space<vmem>>, %arg3: memref<8x1xi32, #tpu.memory_space<vmem>>, %arg4: memref<1x1x128xf32, #tpu.memory_space<vmem>>, %arg5: memref<8x1xf32, #tpu.memory_space<vmem>>) attributes {dimension_semantics = [#tpu.dimension_semantics<parallel>, #tpu.dimension_semantics<arbitrary>], iteration_bounds = array<i64: 1, 1>, scalar_prefetch = 0 : i64, scratch_operands = 1 : i64, tpu.core_type = #tpu.core_type<tc>, window_params = [{transform_indices = @transform_0, window_bounds = array<i64: 8, 16>}, {transform_indices = @transform_1, window_bounds = array<i64: 8, 1>}, {transform_indices = @transform_2, window_bounds = array<i64: 1, 1, 128>}]} {
    %c0_i32 = arith.constant 0 : i32
    %0 = arith.cmpi eq, %arg1, %c0_i32 : i32
    %1 = arith.extui %0 : i1 to i32
    %c0_i32_0 = arith.constant 0 : i32
    %2 = arith.cmpi ne, %1, %c0_i32_0 : i32
    scf.if %2 {
      %cst_17 = arith.constant 0.000000e+00 : f32
      %40 = vector.broadcast %cst_17 : f32 to vector<8x1xf32>
      %c0_18 = arith.constant 0 : index
      %c0_19 = arith.constant 0 : index
      %41 = vector.load %arg5[%c0_18, %c0_19] : memref<8x1xf32, #tpu.memory_space<vmem>>, vector<8x1xf32>
      tpu.vector_store %arg5[%c0_18, %c0_19], %40 {strides = array<i32>} : memref<8x1xf32, #tpu.memory_space<vmem>>, vector<8x1xf32>,
    } else {
    }
    %c0 = arith.constant 0 : index
    %c0_1 = arith.constant 0 : index
    %3 = vector.load %arg2[%c0, %c0_1] : memref<8x16xf32, #tpu.memory_space<vmem>>, vector<8x16xf32>
    %c0_2 = arith.constant 0 : index
    %c0_3 = arith.constant 0 : index
    %4 = vector.load %arg3[%c0_2, %c0_3] : memref<8x1xi32, #tpu.memory_space<vmem>>, vector<8x1xi32>
    %cst = arith.constant dense<0xFF800000> : vector<8xf32>
    %5 = vector.multi_reduction <maximumf>, %3, %cst [1] : vector<8x16xf32> to vector<8xf32>
    %6 = vector.shape_cast %5 : vector<8xf32> to vector<8x1xf32>
    %7 = vector.broadcast %6 : vector<8x1xf32> to vector<8x16xf32>
    %8 = arith.subf %3, %7 : vector<8x16xf32>
    %9 = math.exp %8 : vector<8x16xf32>
    %cst_4 = arith.constant dense<0.000000e+00> : vector<8xf32>
    %10 = vector.multi_reduction <add>, %9, %cst_4 [1] : vector<8x16xf32> to vector<8xf32>
    %11 = vector.shape_cast %10 : vector<8xf32> to vector<8x1xf32>
    %12 = tpu.iota {dimensions = array<i32: 1>} : vector<8x16xi32>
    %13 = vector.broadcast %4 : vector<8x1xi32> to vector<8x16xi32>
    %14 = arith.cmpi eq, %12, %13 : vector<8x16xi32>
    %cst_5 = arith.constant 0.000000e+00 : f32
    %15 = vector.broadcast %cst_5 : f32 to vector<8x16xf32>
    %16 = arith.select %14, %3, %15 : vector<8x16xi1>, vector<8x16xf32>
    %cst_6 = arith.constant dense<0.000000e+00> : vector<8xf32>
    %17 = vector.multi_reduction <add>, %16, %cst_6 [1] : vector<8x16xf32> to vector<8xf32>
    %18 = vector.shape_cast %17 : vector<8xf32> to vector<8x1xf32>
    %19 = math.log %11 : vector<8x1xf32>
    %20 = arith.addf %19, %6 : vector<8x1xf32>
    %21 = arith.subf %20, %18 : vector<8x1xf32>
    %cst_7 = arith.constant 0.000000e+00 : f32
    %22 = vector.broadcast %cst_7 : f32 to vector<8x1xf32>
    %23 = arith.subf %22, %21 : vector<8x1xf32>
    %24 = math.exp %23 : vector<8x1xf32>
    %cst_8 = arith.constant 1.000000e+00 : f32
    %25 = vector.broadcast %cst_8 : f32 to vector<8x1xf32>
    %26 = arith.subf %25, %24 : vector<8x1xf32>
    %27 = arith.mulf %26, %26 : vector<8x1xf32>
    %cst_9 = arith.constant 2.500000e-01 : f32
    %28 = vector.broadcast %cst_9 : f32 to vector<8x1xf32>
    %29 = arith.mulf %28, %27 : vector<8x1xf32>
    %30 = arith.mulf %29, %21 : vector<8x1xf32>
    %cst_10 = arith.constant 1.000000e+00 : f32
    %31 = vector.broadcast %cst_10 : f32 to vector<8x1xf32>
    %32 = arith.mulf %31, %30 : vector<8x1xf32>
    %33 = arith.addf %21, %32 : vector<8x1xf32>
    %c0_11 = arith.constant 0 : index
    %c0_12 = arith.constant 0 : index
    %34 = vector.load %arg5[%c0_11, %c0_12] : memref<8x1xf32, #tpu.memory_space<vmem>>, vector<8x1xf32>
    %35 = arith.addf %34, %33 : vector<8x1xf32>
    %c0_13 = arith.constant 0 : index
    %c0_14 = arith.constant 0 : index
    %36 = vector.load %arg5[%c0_13, %c0_14] : memref<8x1xf32, #tpu.memory_space<vmem>>, vector<8x1xf32>
    tpu.vector_store %arg5[%c0_13, %c0_14], %35 {strides = array<i32>} : memref<8x1xf32, #tpu.memory_space<vmem>>, vector<8x1xf32>,
    %c0_i32_15 = arith.constant 0 : i32
    %37 = arith.cmpi eq, %arg1, %c0_i32_15 : i32
    %38 = arith.extui %37 : i1 to i32
    %c0_i32_16 = arith.constant 0 : i32
    %39 = arith.cmpi ne, %38, %c0_i32_16 : i32
    scf.if %39 {
      %cst_17 = arith.constant 0.000000e+00 : f32
      %40 = vector.broadcast %cst_17 : f32 to vector<1x1x128xf32>
      %c0_18 = arith.constant 0 : index
      %c0_19 = arith.constant 0 : index
      %41 = vector.load %arg5[%c0_18, %c0_19] : memref<8x1xf32, #tpu.memory_space<vmem>>, vector<8x1xf32>
      %42 = vector.shape_cast %41 : vector<8x1xf32> to vector<1x8x1xf32>
      %cst_20 = arith.constant dense<0.000000e+00> : vector<1xf32>
      %43 = vector.multi_reduction <add>, %42, %cst_20 [1, 2] : vector<1x8x1xf32> to vector<1xf32>
      %44 = vector.shape_cast %43 : vector<1xf32> to vector<1x1x1xf32>
      %45 = vector.extract %44[0, 0, 0] : f32 from vector<1x1x1xf32>
      %46 = vector.broadcast %45 : f32 to vector<1x1x128xf32>
      %47 = arith.addf %40, %46 : vector<1x1x128xf32>
      %c0_21 = arith.constant 0 : index
      %c0_22 = arith.constant 0 : index
      %c0_23 = arith.constant 0 : index
      %48 = vector.load %arg4[%c0_21, %c0_22, %c0_23] : memref<1x1x128xf32, #tpu.memory_space<vmem>>, vector<1x1x128xf32>
      tpu.vector_store %arg4[%c0_21, %c0_22, %c0_23], %47 {strides = array<i32>} : memref<1x1x128xf32, #tpu.memory_space<vmem>>, vector<1x1x128xf32>,
    } else {
    }
    return
  }
  func.func @transform_0(%arg0: i32, %arg1: i32) -> (i32, i32) {
    %c1_i32 = arith.constant 1 : i32
    %0 = arith.muli %arg0, %c1_i32 : i32
    %1 = arith.addi %0, %arg1 : i32
    %c0_i32 = arith.constant 0 : i32
    %2 = arith.minsi %1, %c0_i32 : i32
    %c0_i32_0 = arith.constant 0 : i32
    %c0_i32_1 = arith.constant 0 : i32
    return %2, %c0_i32_0 : i32, i32
  }
  func.func @transform_1(%arg0: i32, %arg1: i32) -> (i32, i32) {
    %c1_i32 = arith.constant 1 : i32
    %0 = arith.muli %arg0, %c1_i32 : i32
    %1 = arith.addi %0, %arg1 : i32
    %c0_i32 = arith.constant 0 : i32
    %2 = arith.minsi %1, %c0_i32 : i32
    %c0_i32_0 = arith.constant 0 : i32
    %c0_i32_1 = arith.constant 0 : i32
    return %2, %c0_i32_0 : i32, i32
  }
  func.func @transform_2(%arg0: i32, %arg1: i32) -> (i32, i32, i32) {
    %c0_i32 = arith.constant 0 : i32
    %c0_i32_0 = arith.constant 0 : i32
    %c0_i32_1 = arith.constant 0 : i32
    return %arg0, %c0_i32, %c0_i32_0 : i32, i32, i32
  }
}

</mosaic_0001>

<bundles_post_ra>
// kernel: tpu_custom_call.1
= control target key start
LH: loop header
LB: loop body
LE: loop exit
PB: predicated region body
PF: predicated region fallthrough
CT: control target
= control target key end

     0   :  { %vm74_vm0 = vcmask 130048   ;;  %s220_s0 = inlined_call_operand.vmem [shape: f32[8,16], index: 0, kind: input, shape index: {}]   ;;  %s221_s1 = inlined_call_operand.vmem [shape: s32[8,1], index: 1, kind: input, shape index: {}]   ;;  %s222_s2 = inlined_call_operand.hbm [shape: f32[1,1,128], index: 2, kind: output, shape index: {}]  }
   0x1   :  { %v72_v0 = vld [vmem:[%s220_s0] sm:$0xff] }
   0x2   :  { %7 = vsyncpa [#allocation4], 0  ;;  %v75_v1 = vsel %vm74_vm0, %v72_v0, -inf  ;;  %v187_v2 = vmov 0   ;;  %v73_v3 = vld [vmem:[%s221_s1] sm:$0xff]  ;;  %v84_v7 = vlaneseq  ;;  %vm70_vm2 = vcmask 7168  }
   0x3   :  { %158 = vset.pattern.permute.xlu0 %v187_v2  ;;  %v188_v14 = vmov 0.0   ;;  %s189_s0 = smov [#allocation3]  }
   0x4   :  { %76 = vmax.xlane.f32.xlu0 %v75_v1  ;;  %v85_v8 = vand.u32 127, %v84_v7  ;;  %71 = vst.msk [vmem:[#allocation2] sm:$0xff] %vm70_vm2, %v188_v14  ;;  %s133_s1 = sshll.u32 %s189_s0, 4  ;;  %s134_s1 = int_to_ptr.vmem [resolvable:$true] %s133_s1 }
   0x5   :  { %s165_s14 = scalar_lea.vmem %s134_s1, 16  ;;  %s169_s15 = scalar_lea.vmem %s134_s1, 32 }
   0x6   :  { %p166_p0 = scmp.ne.s32.totalorder %s134_s1, %s165_s14  ;;  %p170_p1 = scmp.lt.s32.totalorder %s134_s1, %s134_s1 }
   0x7   :  { %p171_p2 = scmp.lt.s32.totalorder %s169_s15, %s165_s14 }
   0x9   :  { %p172_p3 = por %p171_p2, %p170_p1 }
   0xb   :  { %v106_v28 = vld [vmem:[#allocation2] sm:$0xff]  ;;  %p173_p4 = pnand %p172_p3, %p166_p0 }
  0x1a   :  { %87 = vperm.xlu0 %158, %v73_v3  }
  0x8d   :  { %v77_v4 = vpop.xlane.xlu0 %76 }
  0x8e   :  { %v78_v5 = vsub.f32 %v72_v0, %v77_v4 }
  0x90   :  { %v79_v6 = vmul.f32 1.442695, %v78_v5 }
  0x92   :  { %159 = vpow2.f32 %v79_v6 }
  0x95   :  { %v88_v9 = vpop.permute.xlu0 %87 }
  0x96   :  { %vm89_vm1 = vcmp.eq.s32.totalorder %v85_v8, %v88_v9 }
  0x97   :  { %v90_v11 = vsel %vm89_vm1, %v72_v0, 0.0 }
  0x98   :  { %v91_v13 = vsel %vm74_vm0, %v90_v11, 0.0 }
  0x9f   :  { %v160_v10 = vpop.eup %159 }
  0xa0   :  { %v81_v12 = vsel %vm74_vm0, %v160_v10, 0.0 }
  0xa1   :  { %82 = vadd.xlane.f32.xlu1 %v81_v12 }
  0xa5   :  { %92 = vadd.xlane.f32.xlu1 %v91_v13 }
 0x12a   :  { %v83_v15 = vpop.xlane.xlu1 %82 }
 0x12b   :  { %161 = vlog2.f32 %v83_v15 }
 0x12e   :  { %v93_v18 = vpop.xlane.xlu1 %92 }
 0x138   :  { %v162_v16 = vpop.eup %161 }
 0x139   :  { %v95_v17 = vmul.f32 0.6931472, %v162_v16 }
 0x13b   :  { %v96_v19 = vadd.f32 %v95_v17, %v77_v4 }
 0x13d   :  { %v97_v20 = vsub.f32 %v96_v19, %v93_v18 }
 0x13f   :  { %v98_v21 = vsub.f32 0.0, %v97_v20 }
 0x141   :  { %v99_v22 = vmul.f32 1.442695, %v98_v21 }
 0x143   :  { %163 = vpow2.f32 %v99_v22 }
 0x150   :  { %v164_v23 = vpop.eup %163 }
 0x151   :  { %v101_v24 = vsub.f32 1.0, %v164_v23 }
 0x153   :  { %v102_v25 = vmul.f32 %v101_v24, %v101_v24 }
 0x155   :  { %v103_v26 = vmul.f32 0.25, %v102_v25 }
 0x157   :  { %v104_v27 = vmul.f32 %v103_v26, %v97_v20 }
 0x159   :  { %v105_v29 = vadd.f32 %v104_v27, %v97_v20 }
 0x15b   :  { %v107_v30 = vadd.f32 %v106_v28, %v105_v29 }
 0x15d   :  { %109 = vst.msk [vmem:[#allocation2] sm:$0xff] %vm70_vm2, %v107_v30 }
 0x164   :  { %v113_v31 = vld [vmem:[#allocation2] sm:$0xff] }
 0x165   :  { %v114_v32 = vsel %vm70_vm2, %v113_v31, 0.0 }
 0x166   :  { %115 = vadd.xlane.f32.xlu1 %v114_v32 }
 0x1ef   :  { %v116_v33 = vpop.xlane.xlu1 %115 }
 0x1f0   :  { %v117_v34 = vrot.slane %v116_v33, 4 }
 0x1f2   :  { %v118_v35 = vadd.f32 %v117_v34, %v116_v33 }
 0x1f4   :  { %v119_v36 = vrot.slane %v118_v35, 2 }
 0x1f6   :  { %v120_v37 = vadd.f32 %v119_v36, %v118_v35 }
 0x1f8   :  { %v121_v38 = vrot.slane %v120_v37, 1 }
 0x1fa   :  { %v122_v39 = vadd.f32 %v121_v38, %v120_v37 }
 0x1fc   :  { %153 = vpush %v122_v39 }
 0x22d   :  { %s154_s13 = spop %153 }
 0x22e   :  { %v124_v40 = vstv %s154_s13 }
 0x22f   :  { %126 = vst [vmem:[#allocation3] sm:$0x1] %v124_v40 }
 0x230   :  { %176 = shalt.err (!%p173_p4)
}
 0x231   :  { %136 = dma.vmem_to_hbm [thread:$0]  %s134_s1, 16, %s222_s2, [#allocation4]  }
 0x232   :  { %185 = dma.done.wait [#allocation4], 16  }
 0x233   :  { %186 = vsyncadd [#allocation4], 4294967280 }
 0x234   :  { %140 = vsyncpa [#allocation4], 1 }

</bundles_post_ra>
